<compile_context>
chip_gen: v7x
topology: tpu7x:2x2x1
jax: 0.10.0
libtpu: 0.0.40
codegen_flags: <defaults>
</compile_context>

<pallas_src>
import functools

import jax
import jax.numpy as jnp
from jax.experimental import pallas as pl
from jax.experimental.pallas import tpu as pltpu


def _round_up(x, m):
    return ((x + m - 1) // m) * m


# ----------------------------------------------------------------------------
# Linear (projection) kernel: y = x @ w + b, tiled over rows and output columns
# ----------------------------------------------------------------------------
def _linear_kernel(x_ref, w_ref, b_ref, o_ref):
    acc = jnp.dot(x_ref[...], w_ref[...], preferred_element_type=jnp.float32)
    o_ref[...] = (acc + b_ref[...]).astype(o_ref.dtype)


def _pick_col_tile(d_in, d_out, max_bytes=4 << 20):
    """Largest column tile whose (d_in, dn) f32 weight tile stays <= max_bytes."""
    if d_in * d_out * 4 <= max_bytes:
        return d_out
    cap = max(128, (max_bytes // (4 * d_in)) // 128 * 128)
    for dn in range(cap, 0, -128):
        if d_out % dn == 0:
            return dn
    return d_out  # fallback: keep full width (rare; d_out not a multiple of 128)


def pallas_linear(x, w, b, *, tn=256):
    """y = x @ w + b.  x: (N, d_in), w: (d_in, d_out), b: (d_out,)."""
    N, d_in = x.shape
    d_out = w.shape[1]
    tn = min(tn, _round_up(N, 8))
    n_pad = _round_up(N, tn)
    if n_pad != N:
        x = jnp.pad(x, ((0, n_pad - N), (0, 0)))
    dn = _pick_col_tile(d_in, d_out)
    b2 = b.reshape(1, d_out)
    # TODO(synk): for very large d_in add a K-axis grid with a VMEM f32
    # accumulator; here the full d_in stays resident per step.
    y = pl.pallas_call(
        _linear_kernel,
        out_shape=jax.ShapeDtypeStruct((n_pad, d_out), x.dtype),
        grid=(n_pad // tn, d_out // dn),
        in_specs=[
            pl.BlockSpec((tn, d_in), lambda i, j: (i, 0)),
            pl.BlockSpec((d_in, dn), lambda i, j: (0, j)),
            pl.BlockSpec((1, dn), lambda i, j: (0, j)),
        ],
        out_specs=pl.BlockSpec((tn, dn), lambda i, j: (i, j)),
        compiler_params=pltpu.CompilerParams(
            dimension_semantics=("parallel", "parallel")),
    )(x, w, b2)
    return y[:N] if n_pad != N else y


# ----------------------------------------------------------------------------
# Block-diagonal (within-chunk) attention kernel
# ----------------------------------------------------------------------------
def _pick_head_group(nhead, d_k, chunk, budget=8 << 20):
    """Heads processed per program.  Must be == nhead or a multiple of 8 (tiling)."""
    cands = [hg for hg in range(1, nhead + 1)
             if nhead % hg == 0 and (hg == nhead or hg % 8 == 0)]

    def cost(hg):  # rough VMEM footprint: f32 score/prob + double-buffered tiles
        return hg * chunk * chunk * 4 * 2 + 8 * chunk * hg * d_k * 4

    fitting = [hg for hg in cands if cost(hg) <= budget]
    return max(fitting) if fitting else min(cands)


def _chunk_attn_kernel(q_ref, k_ref, v_ref, o_ref, *, scale, chunk, s_valid,
                       ragged, n_heads):
    # refs: (chunk, n_heads, d_k)
    if ragged:
        valid = jnp.minimum(s_valid - pl.program_id(0) * chunk, chunk)
        kpos = jax.lax.broadcasted_iota(jnp.int32, (chunk, chunk), 1)
        neg = jnp.where(kpos < valid, 0.0, -jnp.inf).astype(jnp.float32)

    for h in range(n_heads):  # static unroll; each head is a clean 2-D MXU matmul
        qh = q_ref[:, h, :]
        kh = k_ref[:, h, :]
        vh = v_ref[:, h, :]
        # scores: contract last axes directly (no explicit transpose of K)
        s = jax.lax.dot_general(qh, kh, (((1,), (1,)), ((), ())),
                                preferred_element_type=jnp.float32) * scale
        if ragged:
            s = s + neg
        s = s - jnp.max(s, axis=-1, keepdims=True)
        p = jnp.exp(s)
        p = p * pl.reciprocal(jnp.sum(p, axis=-1, keepdims=True), approx=True)
        oh = jax.lax.dot_general(p.astype(vh.dtype), vh, (((1,), (0,)), ((), ())),
                                 preferred_element_type=jnp.float32)
        o_ref[:, h, :] = oh.astype(o_ref.dtype)


def pallas_chunk_attention(q_arr, k_arr, v_arr, sel, *, s_valid, chunk, nhead, d_k):
    """Within-chunk attention.

    q_arr/k_arr/v_arr: (S_pad, B, Q, nhead, d_k) where Q is 3 (packed fused QKV,
    the same array passed three times, sel=(0,1,2)) or 1 (separate projections,
    sel=(0,0,0)).  Output: (S_pad, B, nhead, d_k).
    """
    S_pad, B = q_arr.shape[0], q_arr.shape[1]
    num_chunks = S_pad // chunk
    hg = _pick_head_group(nhead, d_k, chunk)
    n_grp = nhead // hg
    scale = 1.0 / (d_k ** 0.5)
    ragged = (s_valid != S_pad)

    blk_in = (chunk, pl.Squeezed(), pl.Squeezed(), hg, d_k)

    def in_spec(qi):
        return pl.BlockSpec(blk_in, lambda c, b, g: (c, b, qi, g, 0))

    kernel = functools.partial(_chunk_attn_kernel, scale=scale, chunk=chunk,
                               s_valid=s_valid, ragged=ragged, n_heads=hg)
    return pl.pallas_call(
        kernel,
        out_shape=jax.ShapeDtypeStruct((S_pad, B, nhead, d_k), q_arr.dtype),
        grid=(num_chunks, B, n_grp),
        in_specs=[in_spec(sel[0]), in_spec(sel[1]), in_spec(sel[2])],
        out_specs=pl.BlockSpec((chunk, pl.Squeezed(), hg, d_k),
                               lambda c, b, g: (c, b, g, 0)),
        compiler_params=pltpu.CompilerParams(
            dimension_semantics=("parallel", "parallel", "parallel")),
    )(q_arr, k_arr, v_arr)


# ----------------------------------------------------------------------------
# Module wrapper
# ----------------------------------------------------------------------------
class MemoryEfficientMultiheadAttentionPallas:
    def __init__(self, d_model, nhead, chunk_size=256, *, key):
        assert d_model % nhead == 0
        self.d_model = d_model
        self.nhead = nhead
        self.d_k = d_model // nhead
        self.chunk_size = chunk_size

        ks = jax.random.split(key, 8)
        bound = 1.0 / (d_model ** 0.5)  # nn.Linear default init range

        def make_linear(kw, kb):
            # stored as (d_in, d_out)  (torch stores (d_out, d_in) and does x @ W.T)
            w = jax.random.uniform(kw, (d_model, d_model), jnp.float32, -bound, bound)
            b = jax.random.uniform(kb, (d_model,), jnp.float32, -bound, bound)
            return w, b

        self.q_w, self.q_b = make_linear(ks[0], ks[1])
        self.k_w, self.k_b = make_linear(ks[2], ks[3])
        self.v_w, self.v_b = make_linear(ks[4], ks[5])
        self.o_w, self.o_b = make_linear(ks[6], ks[7])
        # fused QKV weight for the self-attention fast path (columns = [Wq|Wk|Wv])
        self.qkv_w = jnp.concatenate([self.q_w, self.k_w, self.v_w], axis=1)
        self.qkv_b = jnp.concatenate([self.q_b, self.k_b, self.v_b], axis=0)

    def __call__(self, query, key, value, key_padding_mask=None):
        # key_padding_mask is accepted but unused, exactly like the reference.
        S, B, d_model = query.shape
        H, d_k = self.nhead, self.d_k
        chunk = min(self.chunk_size, S)
        S_pad = _round_up(S, chunk)

        def pad_s(x):
            return x if S_pad == S else jnp.pad(x, ((0, S_pad - S), (0, 0), (0, 0)))

        fused = (query is key) and (key is value)
        if fused:
            # one pass over x, one kernel, 3x wider MXU N dimension
            x_rows = pad_s(query).reshape(S_pad * B, d_model)
            y = pallas_linear(x_rows, self.qkv_w, self.qkv_b)        # (N, 3*d_model)
            yq = yk = yv = y.reshape(S_pad, B, 3, H, d_k)            # free reshape
            sel = (0, 1, 2)
        else:
            yq = pallas_linear(pad_s(query).reshape(S_pad * B, d_model),
                               self.q_w, self.q_b).reshape(S_pad, B, 1, H, d_k)
            yk = pallas_linear(pad_s(key).reshape(S_pad * B, d_model),
                               self.k_w, self.k_b).reshape(S_pad, B, 1, H, d_k)
            yv = pallas_linear(pad_s(value).reshape(S_pad * B, d_model),
                               self.v_w, self.v_b).reshape(S_pad, B, 1, H, d_k)
            sel = (0, 0, 0)

        o = pallas_chunk_attention(yq, yk, yv, sel, s_valid=S, chunk=chunk,
                                   nhead=H, d_k=d_k)                 # (S_pad,B,H,d_k)
        if S_pad != S:
            o = o[:S]
        o = o.reshape(S * B, d_model)                                # free head-merge
        out = pallas_linear(o, self.o_w, self.o_b).reshape(S, B, d_model)
        return out, None


# ----------------------------------------------------------------------------
# Pure-JAX reference (mirrors the PyTorch forward) for validation
# ----------------------------------------------------------------------------
def reference_forward(mha, query, key, value):
    S, B, d_model = query.shape
    H, d_k = mha.nhead, mha.d_k

    def lin(x, w, b):
        return x @ w + b

    def split(x):
        return x.reshape(S, B, H, d_k).transpose(1, 2, 0, 3)  # (B, H, S, d_k)

    q = split(lin(query, mha.q_w, mha.q_b))
    k = split(lin(key, mha.k_w, mha.k_b))
    v = split(lin(value, mha.v_w, mha.v_b))

    outs = []
    cs = mha.chunk_size
    for i in range(0, S, cs):
        qc, kc, vc = q[:, :, i:i + cs], k[:, :, i:i + cs], v[:, :, i:i + cs]
        s = jnp.einsum('bhqd,bhkd->bhqk', qc, kc) / (d_k ** 0.5)
        p = jax.nn.softmax(s, axis=-1)
        outs.append(jnp.einsum('bhqk,bhkd->bhqd', p, vc))
    o = jnp.concatenate(outs, axis=2)                          # (B, H, S, d_k)
    o = o.transpose(2, 0, 1, 3).reshape(S, B, d_model)
    return lin(o, mha.o_w, mha.o_b)


# ----------------------------------------------------------------------------
if __name__ == "__main__":
    d_model, nhead, chunk_size = 32, 4, 8
    S, B = 16, 2  # two chunks of 8 -> exercises the block-diagonal path

    mha = MemoryEfficientMultiheadAttentionPallas(
        d_model, nhead, chunk_size=chunk_size, key=jax.random.PRNGKey(0))

    kq, kk, kv = jax.random.split(jax.random.PRNGKey(1), 3)
    query = jax.random.normal(kq, (S, B, d_model), jnp.float32)
    key_in = jax.random.normal(kk, (S, B, d_model), jnp.float32)
    value = jax.random.normal(kv, (S, B, d_model), jnp.float32)

    # 1) cross-attention path (three separate projections)
    out, attn = mha(query, key_in, value)
    out = jax.block_until_ready(out)
    ref = reference_forward(mha, query, key_in, value)
    assert out.shape == (S, B, d_model)
    assert attn is None
    assert jnp.allclose(out, ref, atol=2e-3, rtol=2e-3), "cross-attn mismatch"

    # 2) self-attention path (fused QKV projection, packed layout)
    out_sa, _ = mha(query, query, query)
    out_sa = jax.block_until_ready(out_sa)
    ref_sa = reference_forward(mha, query, query, query)
    assert jnp.allclose(out_sa, ref_sa, atol=2e-3, rtol=2e-3), "self-attn mismatch"

    # 3) ragged sequence (S not a multiple of chunk_size) -> padded + masked path
    S2 = 13
    q2 = jax.random.normal(jax.random.PRNGKey(2), (S2, B, d_model), jnp.float32)
    out_r, _ = mha(q2, q2, q2)
    out_r = jax.block_until_ready(out_r)
    ref_r = reference_forward(mha, q2, q2, q2)
    assert out_r.shape == (S2, B, d_model)
    assert jnp.allclose(out_r, ref_r, atol=2e-3, rtol=2e-3), "ragged mismatch"

    print("KERNEL_OK")
</pallas_src>

<mosaic_0001>
module attributes {stable_mosaic.version = 11 : i64} {
  func.func @_linear_kernel(%arg0: i32, %arg1: i32, %arg2: memref<32x32xf32, #tpu.memory_space<vmem>>, %arg3: memref<32x32xf32, #tpu.memory_space<vmem>>, %arg4: memref<1x32xf32, #tpu.memory_space<vmem>>, %arg5: memref<32x32xf32, #tpu.memory_space<vmem>>) attributes {dimension_semantics = [#tpu.dimension_semantics<parallel>, #tpu.dimension_semantics<parallel>], iteration_bounds = array<i64: 1, 1>, scalar_prefetch = 0 : i64, scratch_operands = 0 : i64, tpu.core_type = #tpu.core_type<tc>, window_params = [{transform_indices = @transform_0, window_bounds = array<i64: 32, 32>}, {transform_indices = @transform_1, window_bounds = array<i64: 32, 32>}, {transform_indices = @transform_2, window_bounds = array<i64: 1, 32>}, {transform_indices = @transform_3, window_bounds = array<i64: 32, 32>}]} {
    %c0 = arith.constant 0 : index
    %c0_0 = arith.constant 0 : index
    %0 = vector.load %arg2[%c0, %c0_0] : memref<32x32xf32, #tpu.memory_space<vmem>>, vector<32x32xf32>
    %c0_1 = arith.constant 0 : index
    %c0_2 = arith.constant 0 : index
    %1 = vector.load %arg3[%c0_1, %c0_2] : memref<32x32xf32, #tpu.memory_space<vmem>>, vector<32x32xf32>
    %cst = arith.constant dense<0.000000e+00> : vector<32x32xf32>
    %2 = tpu.matmul %0, %1, %cst {dimension_numbers = #tpu.dot_dimension_numbers<[1], [0], [0], [1], [0, 0, 1, 1], [], []>} : vector<32x32xf32>, vector<32x32xf32>, vector<32x32xf32> -> vector<32x32xf32>
    %c0_3 = arith.constant 0 : index
    %c0_4 = arith.constant 0 : index
    %3 = vector.load %arg4[%c0_3, %c0_4] : memref<1x32xf32, #tpu.memory_space<vmem>>, vector<1x32xf32>
    %4 = vector.broadcast %3 : vector<1x32xf32> to vector<32x32xf32>
    %5 = arith.addf %2, %4 : vector<32x32xf32>
    %c0_5 = arith.constant 0 : index
    %c0_6 = arith.constant 0 : index
    %6 = vector.load %arg5[%c0_5, %c0_6] : memref<32x32xf32, #tpu.memory_space<vmem>>, vector<32x32xf32>
    tpu.vector_store %arg5[%c0_5, %c0_6], %5 {strides = array<i32>} : memref<32x32xf32, #tpu.memory_space<vmem>>, vector<32x32xf32>,
    return
  }
  func.func @transform_0(%arg0: i32, %arg1: i32) -> (i32, i32) {
    %c0_i32 = arith.constant 0 : i32
    %c0_i32_0 = arith.constant 0 : i32
    return %arg0, %c0_i32 : i32, i32
  }
  func.func @transform_1(%arg0: i32, %arg1: i32) -> (i32, i32) {
    %c0_i32 = arith.constant 0 : i32
    %c0_i32_0 = arith.constant 0 : i32
    return %c0_i32, %arg1 : i32, i32
  }
  func.func @transform_2(%arg0: i32, %arg1: i32) -> (i32, i32) {
    %c0_i32 = arith.constant 0 : i32
    %c0_i32_0 = arith.constant 0 : i32
    return %c0_i32, %arg1 : i32, i32
  }
  func.func @transform_3(%arg0: i32, %arg1: i32) -> (i32, i32) {
    %c0_i32 = arith.constant 0 : i32
    return %arg0, %arg1 : i32, i32
  }
}

</mosaic_0001>

<bundles_post_ra>
// kernel: tpu_custom_call.1
= control target key start
LH: loop header
LB: loop body
LE: loop exit
PB: predicated region body
PF: predicated region fallthrough
CT: control target
= control target key end

     0   :  { %8 = vsyncpa [#allocation3], 0  ;;  %s375_s0 = inlined_call_operand.hbm [shape: f32[32,32], index: 0, kind: input, shape index: {}]   ;;  %s376_s1 = inlined_call_operand.hbm [shape: f32[32,32], index: 1, kind: input, shape index: {}]   ;;  %s377_s2 = inlined_call_operand.vmem [shape: f32[1,32], index: 2, kind: input, shape index: {}]   ;;  %s378_s3 = inlined_call_operand.hbm [shape: f32[32,32], index: 3, kind: output, shape index: {}]  }
   0x1   :  { %9 = vsyncpa [#allocation6], 0 }
   0x2   :  { %10 = vsyncpa [#allocation4], 0  ;;  %s294_s12 = smov [#allocation2]   ;;  %s222_s16 = scalar_lea.hbm %s375_s0, 512 }
   0x3   :  { %s16_s13 = sshll.u32 %s294_s12, 4  ;;  %p223_p0 = scmp.ne.s32.totalorder %s375_s0, %s222_s16  ;;  %s17_s13 = int_to_ptr.vmem [resolvable:$true] %s16_s13 }
   0x4   :  { %p226_p1 = scmp.lt.u32.totalorder %s222_s16, %s375_s0 }
   0x6   :  { %p228_p2 = pnand %p226_p1, %p223_p0 }
   0x8   :  { %231 = shalt.err (!%p228_p2)
}
   0x9   :  { %s232_s21 = scalar_lea.vmem %s17_s13, 512  ;;  %p237_p4 = scmp.lt.s32.totalorder %s17_s13, %s17_s13 }
   0xa   :  { %p233_p3 = scmp.ne.s32.totalorder %s17_s13, %s232_s21  ;;  %p238_p5 = scmp.lt.s32.totalorder %s232_s21, %s232_s21 }
   0xc   :  { %p239_p6 = por %p238_p5, %p237_p4 }
   0xe   :  { %p240_p7 = pnand %p239_p6, %p233_p3 }
  0x10   :  { %243 = shalt.err (!%p240_p7)
}
  0x11   :  { %s295_s22 = smov 128   ;;  %s296_s23 = smov 8  }
  0x12   :  { %22 = dma.hbm_to_vmem [thread:$0]  %s375_s0, 512, %s17_s13, [#allocation3], %s295_s22, %s295_s22, %s296_s23  }
  0x13   :  { %s297_s26 = smov [#allocation5]   ;;  %s244_s30 = scalar_lea.hbm %s376_s1, 512 }
  0x14   :  { %s28_s27 = sshll.u32 %s297_s26, 4  ;;  %p245_p8 = scmp.ne.s32.totalorder %s376_s1, %s244_s30  ;;  %s29_s27 = int_to_ptr.vmem [resolvable:$true] %s28_s27 }
  0x15   :  { %p248_p9 = scmp.lt.u32.totalorder %s244_s30, %s376_s1 }
  0x17   :  { %p250_p10 = pnand %p248_p9, %p245_p8 }
  0x19   :  { %253 = shalt.err (!%p250_p10)
}
  0x1a   :  { %s254_s8 = scalar_lea.vmem %s29_s27, 512  ;;  %p259_p12 = scmp.lt.s32.totalorder %s29_s27, %s29_s27 }
  0x1b   :  { %p255_p11 = scmp.ne.s32.totalorder %s29_s27, %s254_s8  ;;  %p260_p13 = scmp.lt.s32.totalorder %s254_s8, %s254_s8 }
  0x1d   :  { %p261_p0 = por %p260_p13, %p259_p12 }
  0x1f   :  { %p262_p1 = pnand %p261_p0, %p255_p11 }
  0x21   :  { %265 = shalt.err (!%p262_p1)
}
  0x22   :  { %34 = dma.hbm_to_vmem [thread:$0]  %s376_s1, 512, %s29_s27, [#allocation6], %s295_s22, %s295_s22, %s296_s23  }
  0x23   :  { %288 = dma.done.wait [#allocation3], 512  }
  0x24   :  { %289 = vsyncadd [#allocation3], 4294966784 }
  0x25   :  { %290 = dma.done.wait [#allocation6], 512  }
  0x26   :  { %291 = vsyncadd [#allocation6], 4294966784  ;;  %vm58_vm0 = vcmask 261120   ;;  %v47_v0 = vld [vmem:[#allocation5] sm:$0xff]  ;;  %v48_v1 = vld [vmem:[#allocation5 + $0x8] sm:$0xff]  ;;  %s298_s11 = smov [#allocation7]  }
  0x27   :  { %v49_v2 = vld [vmem:[#allocation5 + $0x10] sm:$0xff]  ;;  %v205_v3 = vpack.c.bf16 %v48_v1, %v47_v0  ;;  %v50_v4 = vld [vmem:[#allocation5 + $0x18] sm:$0xff]  ;;  %v43_v5 = vld [vmem:[#allocation2] sm:$0xff]  ;;  %s165_s12 = sshll.u32 %s298_s11, 4  ;;  %s166_s12 = int_to_ptr.vmem [resolvable:$true] %s165_s12 }
  0x28   :  { %v45_v6 = vld [vmem:[#allocation2 + $0x10] sm:$0xff]  ;;  %v209_v7 = vpack.c.bf16 %v50_v4, %v49_v2  ;;  %199 = vmatprep.mubr.msk.f32.mxu0 %vm58_vm0, %v43_v5  ;;  %v44_v8 = vld [vmem:[#allocation2 + $0x8] sm:$0xff]  ;;  %v46_v9 = vld [vmem:[#allocation2 + $0x18] sm:$0xff]  ;;  %p271_p3 = scmp.lt.s32.totalorder %s166_s12, %s166_s12 }
  0x29   :  { %202 = vmatprep.mubr.msk.f32.mxu1 %vm58_vm0, %v45_v6  ;;  %206 = vmatprep.subr.bf16.mxu0 %v205_v3  ;;  %v178_v10 = vld [vmem:[%s377_s2] ss:$0 sm:$0xff]  ;;  %s266_s2 = scalar_lea.vmem %s166_s12, 512 }
  0x2a   :  { %213 = vmatprep.subr.bf16.mxu1 %v205_v3  ;;  %208 = vmatpush3.bf16.msra.mxu0 %v205_v3  ;;  %p267_p2 = scmp.ne.s32.totalorder %s166_s12, %s266_s2  ;;  %p272_p4 = scmp.lt.s32.totalorder %s266_s2, %s266_s2 }
  0x2b   :  { %215 = vmatpush3.bf16.msra.mxu1 %v205_v3  ;;  %210 = vmatprep.subr.bf16.mxu0 %v209_v7 }
  0x2c   :  { %214 = vmatprep.subr.bf16.mxu1 %v209_v7  ;;  %p273_p5 = por %p272_p4, %p271_p3 }
  0x2e   :  { %212 = vmatpush3.bf16.msra.mxu0 %v209_v7  ;;  %p274_p6 = pnand %p273_p5, %p267_p2 }
  0x2f   :  { %216 = vmatpush3.bf16.msra.mxu1 %v209_v7 }
  0x31   :  { %200 = vmatmul.mubr.msk.f32.vlgmr.msra.gmra.mrb[0].mxu0 %vm58_vm0, %v44_v8 }
  0x32   :  { %203 = vmatmul.mubr.msk.f32.vlgmr.msra.gmra.mrb[0].mxu1 %vm58_vm0, %v46_v9 }
 0x104   :  { %v201_v11 = vpop.f32.mrb[0].mxu0 }
 0x105   :  { %v204_v12 = vpop.f32.mrb[0].mxu1  ;;  %v143_v13 = vadd.f32 %v201_v11, %v178_v10  ;;  %v137_v15 = vpop.f32.mrb[1].mxu0 }
 0x106   :  { %v153_v14 = vadd.f32 %v204_v12, %v178_v10  ;;  %v147_v16 = vpop.f32.mrb[1].mxu1  ;;  %v138_v17 = vadd.f32 %v178_v10, %v137_v15 }
 0x107   :  { %v148_v18 = vadd.f32 %v178_v10, %v147_v16  ;;  %157 = vst.msk [vmem:[#allocation7 + $0x8] sm:$0xff] %vm58_vm0, %v143_v13 }
 0x108   :  { %159 = vst.msk [vmem:[#allocation7 + $0x18] sm:$0xff] %vm58_vm0, %v153_v14  ;;  %156 = vst.msk [vmem:[#allocation7] sm:$0xff] %vm58_vm0, %v138_v17 }
 0x109   :  { %158 = vst.msk [vmem:[#allocation7 + $0x10] sm:$0xff] %vm58_vm0, %v148_v18 }
 0x10a   :  { %277 = shalt.err (!%p274_p6)
}
 0x10b   :  { %s278_s15 = scalar_lea.hbm %s378_s3, 512 }
 0x10c   :  { %p279_p7 = scmp.ne.s32.totalorder %s378_s3, %s278_s15  ;;  %p282_p8 = scmp.lt.u32.totalorder %s278_s15, %s378_s3 }
 0x10e   :  { %p284_p9 = pnand %p282_p8, %p279_p7 }
 0x110   :  { %287 = shalt.err (!%p284_p9)
}
 0x111   :  { %171 = dma.vmem_to_hbm [thread:$0]  %s166_s12, 512, %s378_s3, [#allocation4], %s295_s22, %s295_s22, %s296_s23  }
 0x112   :  { %292 = dma.done.wait [#allocation4], 512  }
 0x113   :  { %293 = vsyncadd [#allocation4], 4294966784 }
 0x114   :  { %175 = vsyncpa [#allocation3], 1 }
 0x115   :  { %176 = vsyncpa [#allocation6], 1 }
 0x116   :  { %177 = vsyncpa [#allocation4], 1 }

</bundles_post_ra>
